<compile_context>
chip_gen: v7x
topology: tpu7x:2x2x1
jax: 0.10.0
libtpu: 0.0.40
codegen_flags: <defaults>
</compile_context>

<pallas_src>
import math
import functools

import jax
import jax.numpy as jnp
from jax import lax
from jax.experimental import pallas as pl
from jax.experimental.pallas import tpu as pltpu

_EPS2 = 1e-24  # (1e-12)^2 -> matches F.normalize's max(||x||, 1e-12) clamp


def _round_up(v, mult):
    return ((v + mult - 1) // mult) * mult


def _arcface_kernel(tile_tbl_ref, x_ref, w_ref, label_ref, o_ref, *,
                    s, s_cos_m, s_sin_m, th, s_mm, easy_margin, tile_c):
    j = pl.program_id(0)   # class-tile index (outermost)
    i = pl.program_id(1)   # batch-tile index (innermost)

    # cosine = x_n . w_n (both pre-normalized in the wrapper).  Contract the
    # last dims of both tiles (no .T in source) and accumulate in f32.
    cosine = lax.dot_general(x_ref[...], w_ref[...],
                             dimension_numbers=(((1,), (1,)), ((), ())),
                             preferred_element_type=jnp.float32)     # (TB, TC)
    cos_s = cosine * s                                               # s * cosine

    has_label = tile_tbl_ref[i, j] > 0   # scalar SMEM read

    @pl.when(has_label)
    def _():
        c2 = jnp.minimum(cosine * cosine, 1.0)      # square >= 0: top clamp only
        sine = jnp.sqrt(1.0 - c2)
        phi_s = cosine * s_cos_m - sine * s_sin_m   # s * phi
        if easy_margin:
            phi_s = jnp.where(cosine > 0.0, phi_s, cos_s)
        else:
            phi_s = jnp.where(cosine > th, phi_s, cos_s - s_mm)
        tb, tc = cosine.shape
        lbl_local = label_ref[...] - j * tile_c     # (TB, 1) tile-local label
        col = lax.broadcasted_iota(jnp.int32, (tb, tc), 1)
        o_ref[...] = jnp.where(col == lbl_local, phi_s, cos_s).astype(o_ref.dtype)

    @pl.when(jnp.logical_not(has_label))
    def _():
        # No label lands in this class tile: output is just s * cosine.
        o_ref[...] = cos_s.astype(o_ref.dtype)


def arc_margin_product(x, weight, label, *, s=30.0, m=0.5, easy_margin=False,
                       tile_b=256, tile_c=2048, mxu_dtype=jnp.bfloat16,
                       out_dtype=jnp.float32, use_label_tile_gate=True):
    """ArcFace forward.  x: (B, D) f32, weight: (C, D) f32, label: (B,) int."""
    B, D = x.shape
    C, D2 = weight.shape
    assert D == D2

    cos_m = math.cos(m)
    sin_m = math.sin(m)
    th = math.cos(math.pi - m)
    mm = math.sin(math.pi - m) * m

    # --- hoisted normalization (f32), per-class scale folded into the cast ---
    xf = x.astype(jnp.float32)
    x_n = (xf * lax.rsqrt(jnp.maximum(jnp.sum(xf * xf, axis=-1, keepdims=True),
                                      jnp.float32(_EPS2)))).astype(mxu_dtype)
    wf = weight.astype(jnp.float32)
    w_n = (wf * lax.rsqrt(jnp.maximum(jnp.sum(wf * wf, axis=-1, keepdims=True),
                                      jnp.float32(_EPS2)))).astype(mxu_dtype)

    # --- generation-aware VMEM capacity (128 MiB v5e/v6e, 64 MiB v7x) ---
    try:
        vmem_cap = int(getattr(pltpu.get_tpu_info(), "vmem_capacity_bytes",
                               64 << 20))
    except Exception:
        vmem_cap = 64 << 20

    w_bytes = jnp.dtype(mxu_dtype).itemsize
    o_bytes = jnp.dtype(out_dtype).itemsize

    # --- tile sizes: large & lane-dense, double-buffered set <= ~40% of VMEM ---
    tb = min(_round_up(tile_b, 8), _round_up(B, 8))
    tc = min(_round_up(tile_c, 128), _round_up(C, 128))

    def working_set(tb_, tc_):  # double-buffered x, W, labels, output blocks
        return 2 * (tb_ * D * w_bytes + tc_ * D * w_bytes
                    + tb_ * tc_ * o_bytes + tb_ * 4)

    budget = int(0.40 * vmem_cap)
    while tc > 128 and working_set(tb, tc) > budget:
        tc = max(128, _round_up(tc // 2, 128))
    while tb > 8 and working_set(tb, tc) > budget:
        tb = max(8, _round_up(tb // 2, 8))

    Bp = _round_up(B, tb)
    Cp = _round_up(C, tc)
    nb, nc = Bp // tb, Cp // tc

    # Pad to tile multiples (zero rows/cols produce zero cosine; sliced off).
    if Bp != B:
        x_n = jnp.pad(x_n, ((0, Bp - B), (0, 0)))
        label = jnp.pad(label, (0, Bp - B))
    if Cp != C:
        w_n = jnp.pad(w_n, ((0, Cp - C), (0, 0)))

    label = label.astype(jnp.int32)
    label2d = label.reshape(Bp, 1)

    # Per-(batch-tile, class-tile) "contains a label" table (SMEM prefetch).
    if use_label_tile_gate:
        cls_of = (label // tc).reshape(nb, tb)
        tile_tbl = jnp.any(cls_of[:, :, None] == jnp.arange(nc)[None, None, :],
                           axis=1).astype(jnp.int32)
    else:
        tile_tbl = jnp.ones((nb, nc), jnp.int32)   # margin path on every tile

    vmem_limit = int(min(int(0.8 * vmem_cap),
                         max(32 << 20, 2 * working_set(tb, tc))))

    kernel = functools.partial(
        _arcface_kernel,
        s=s, s_cos_m=s * cos_m, s_sin_m=s * sin_m, th=th, s_mm=s * mm,
        easy_margin=easy_margin, tile_c=tc)

    out = pl.pallas_call(
        kernel,
        out_shape=jax.ShapeDtypeStruct((Bp, Cp), out_dtype),
        grid_spec=pltpu.PrefetchScalarGridSpec(
            num_scalar_prefetch=1,
            grid=(nc, nb),                      # class OUTER, batch INNER:
            in_specs=[                          # weight tile fetched once per j
                pl.BlockSpec((tb, D), lambda j, i, tbl: (i, 0)),   # x_n
                pl.BlockSpec((tc, D), lambda j, i, tbl: (j, 0)),   # w_n (const in i)
                pl.BlockSpec((tb, 1), lambda j, i, tbl: (i, 0)),   # labels
            ],
            out_specs=pl.BlockSpec((tb, tc), lambda j, i, tbl: (i, j)),
        ),
        compiler_params=pltpu.CompilerParams(
            dimension_semantics=("parallel", "arbitrary"),
            vmem_limit_bytes=vmem_limit),
        cost_estimate=pl.CostEstimate(
            flops=2 * B * C * D,
            transcendentals=B * C,
            bytes_accessed=(C * D * w_bytes          # weights streamed once
                            + nc * B * D * w_bytes   # x re-streamed per class tile
                            + B * C * o_bytes        # output
                            + nc * B * 4)),          # labels
    )(tile_tbl, x_n, w_n, label2d)

    return out[:B, :C]


def _reference(x, weight, label, *, s=30.0, m=0.5, easy_margin=False):
    eps = 1e-12
    x_n = x / jnp.maximum(jnp.linalg.norm(x, axis=1, keepdims=True), eps)
    w_n = weight / jnp.maximum(jnp.linalg.norm(weight, axis=1, keepdims=True), eps)
    cosine = x_n @ w_n.T
    sine = jnp.sqrt(1.0 - jnp.clip(cosine ** 2, 0.0, 1.0))
    cos_m, sin_m = math.cos(m), math.sin(m)
    th, mm = math.cos(math.pi - m), math.sin(math.pi - m) * m
    phi = cosine * cos_m - sine * sin_m
    if easy_margin:
        phi = jnp.where(cosine > 0, phi, cosine)
    else:
        phi = jnp.where(cosine > th, phi, cosine - mm)
    one_hot = jax.nn.one_hot(label, cosine.shape[1], dtype=jnp.float32)
    return (one_hot * phi + (1.0 - one_hot) * cosine) * s


if __name__ == "__main__":
    # Small shapes consistent with the module: batch=8, in_features=32,
    # out_features(classes)=1000 (non-multiple of 128 -> exercises padding and
    # a multi-tile class grid).
    B, D, C = 8, 32, 1000
    key = jax.random.PRNGKey(0)
    kx, kw, kl = jax.random.split(key, 3)

    x = jax.random.normal(kx, (B, D), dtype=jnp.float32)

    # Deterministic xavier_uniform_-style init for weight (out_features, in_features).
    limit = math.sqrt(6.0 / (C + D))
    weight = jax.random.uniform(kw, (C, D), dtype=jnp.float32,
                                minval=-limit, maxval=limit)

    label = jax.random.randint(kl, (B,), 0, C, dtype=jnp.int32)

    ref = _reference(x, weight, label, s=30.0, m=0.5, easy_margin=False)

    # f32 MXU path on a multi-tile class grid (exercises padding, the
    # class-outer/batch-inner grid and the label-tile gate) -- tight check.
    out_f32 = arc_margin_product(x, weight, label, s=30.0, m=0.5,
                                 easy_margin=False, tile_c=256,
                                 mxu_dtype=jnp.float32)
    out_f32 = jax.block_until_ready(out_f32)
    assert out_f32.shape == (B, C)
    assert jnp.allclose(out_f32, ref, atol=2e-3, rtol=2e-3), \
        float(jnp.max(jnp.abs(out_f32 - ref)))

    # Default bf16 weight/activation streaming path -- looser check.
    out_bf16 = arc_margin_product(x, weight, label, s=30.0, m=0.5,
                                  easy_margin=False)
    out_bf16 = jax.block_until_ready(out_bf16)
    assert out_bf16.shape == (B, C)
    assert jnp.allclose(out_bf16, ref, atol=0.35, rtol=1e-2), \
        float(jnp.max(jnp.abs(out_bf16 - ref)))

    # Gate disabled (margin path on every tile) must match too.
    out_nogate = arc_margin_product(x, weight, label, tile_c=256,
                                    mxu_dtype=jnp.float32,
                                    use_label_tile_gate=False)
    out_nogate = jax.block_until_ready(out_nogate)
    assert jnp.allclose(out_nogate, ref, atol=2e-3, rtol=2e-3)

    # easy_margin branch.
    ref_em = _reference(x, weight, label, s=30.0, m=0.5, easy_margin=True)
    out_em = arc_margin_product(x, weight, label, s=30.0, m=0.5,
                                easy_margin=True, mxu_dtype=jnp.float32)
    out_em = jax.block_until_ready(out_em)
    assert jnp.allclose(out_em, ref_em, atol=2e-3, rtol=2e-3)

    # bf16 logits output option (halves the (B, C) output HBM stream).
    out_b16o = arc_margin_product(x, weight, label, out_dtype=jnp.bfloat16)
    out_b16o = jax.block_until_ready(out_b16o)
    assert out_b16o.shape == (B, C) and out_b16o.dtype == jnp.bfloat16

    print("KERNEL_OK")
</pallas_src>

<mosaic_0001>
module attributes {stable_mosaic.version = 11 : i64} {
  func.func @_arcface_kernel(%arg0: i32, %arg1: i32, %arg2: memref<1x4xi32, #tpu.memory_space<smem>>, %arg3: memref<8x32xf32, #tpu.memory_space<vmem>>, %arg4: memref<256x32xf32, #tpu.memory_space<vmem>>, %arg5: memref<8x1xi32, #tpu.memory_space<vmem>>, %arg6: memref<8x256xf32, #tpu.memory_space<vmem>>) attributes {dimension_semantics = [#tpu.dimension_semantics<parallel>, #tpu.dimension_semantics<arbitrary>], iteration_bounds = array<i64: 4, 1>, scalar_prefetch = 1 : i64, scratch_operands = 0 : i64, tpu.core_type = #tpu.core_type<tc>, window_params = [{transform_indices = @transform_0, window_bounds = array<i64: 8, 32>}, {transform_indices = @transform_1, window_bounds = array<i64: 256, 32>}, {transform_indices = @transform_2, window_bounds = array<i64: 8, 1>}, {transform_indices = @transform_3, window_bounds = array<i64: 8, 256>}]} {
    %c0 = arith.constant 0 : index
    %c0_0 = arith.constant 0 : index
    %0 = vector.load %arg3[%c0, %c0_0] : memref<8x32xf32, #tpu.memory_space<vmem>>, vector<8x32xf32>
    %c0_1 = arith.constant 0 : index
    %c0_2 = arith.constant 0 : index
    %1 = vector.load %arg4[%c0_1, %c0_2] : memref<256x32xf32, #tpu.memory_space<vmem>>, vector<256x32xf32>
    %cst = arith.constant dense<0.000000e+00> : vector<8x256xf32>
    %2 = tpu.matmul %0, %1, %cst {dimension_numbers = #tpu.dot_dimension_numbers<[1], [1], [0], [0], [0, 0, 1, 0], [], []>} : vector<8x32xf32>, vector<256x32xf32>, vector<8x256xf32> -> vector<8x256xf32>
    %cst_3 = arith.constant 3.000000e+01 : f32
    %3 = vector.broadcast %cst_3 : f32 to vector<8x256xf32>
    %4 = arith.mulf %2, %3 : vector<8x256xf32>
    %5 = arith.index_cast %arg1 : i32 to index
    %6 = arith.index_cast %arg0 : i32 to index
    %7 = memref.load %arg2[%5, %6] : memref<1x4xi32, #tpu.memory_space<smem>>
    %c0_i32 = arith.constant 0 : i32
    %8 = arith.cmpi sgt, %7, %c0_i32 : i32
    %9 = arith.extui %8 : i1 to i32
    %c0_i32_4 = arith.constant 0 : i32
    %10 = arith.cmpi ne, %9, %c0_i32_4 : i32
    scf.if %10 {
      %14 = arith.mulf %2, %2 : vector<8x256xf32>
      %cst_6 = arith.constant 1.000000e+00 : f32
      %15 = vector.broadcast %cst_6 : f32 to vector<8x256xf32>
      %16 = arith.minimumf %14, %15 : vector<8x256xf32>
      %cst_7 = arith.constant 1.000000e+00 : f32
      %17 = vector.broadcast %cst_7 : f32 to vector<8x256xf32>
      %18 = arith.subf %17, %16 : vector<8x256xf32>
      %19 = math.sqrt %18 : vector<8x256xf32>
      %cst_8 = arith.constant 26.3274765 : f32
      %20 = vector.broadcast %cst_8 : f32 to vector<8x256xf32>
      %21 = arith.mulf %2, %20 : vector<8x256xf32>
      %cst_9 = arith.constant 14.3827658 : f32
      %22 = vector.broadcast %cst_9 : f32 to vector<8x256xf32>
      %23 = arith.mulf %19, %22 : vector<8x256xf32>
      %24 = arith.subf %21, %23 : vector<8x256xf32>
      %cst_10 = arith.constant -0.87758255 : f32
      %25 = vector.broadcast %cst_10 : f32 to vector<8x256xf32>
      %26 = arith.cmpf ogt, %2, %25 : vector<8x256xf32>
      %cst_11 = arith.constant 7.19138288 : f32
      %27 = vector.broadcast %cst_11 : f32 to vector<8x256xf32>
      %28 = arith.subf %4, %27 : vector<8x256xf32>
      %29 = arith.select %26, %24, %28 : vector<8x256xi1>, vector<8x256xf32>
      %c0_12 = arith.constant 0 : index
      %c0_13 = arith.constant 0 : index
      %30 = vector.load %arg5[%c0_12, %c0_13] : memref<8x1xi32, #tpu.memory_space<vmem>>, vector<8x1xi32>
      %c256_i32 = arith.constant 256 : i32
      %31 = arith.muli %arg0, %c256_i32 : i32
      %32 = vector.broadcast %31 : i32 to vector<8x1xi32>
      %33 = arith.subi %30, %32 : vector<8x1xi32>
      %34 = tpu.iota {dimensions = array<i32: 1>} : vector<8x256xi32>
      %35 = vector.broadcast %33 : vector<8x1xi32> to vector<8x256xi32>
      %36 = arith.cmpi eq, %34, %35 : vector<8x256xi32>
      %37 = arith.select %36, %29, %4 : vector<8x256xi1>, vector<8x256xf32>
      %c0_14 = arith.constant 0 : index
      %c0_15 = arith.constant 0 : index
      %38 = vector.load %arg6[%c0_14, %c0_15] : memref<8x256xf32, #tpu.memory_space<vmem>>, vector<8x256xf32>
      tpu.vector_store %arg6[%c0_14, %c0_15], %37 {strides = array<i32>} : memref<8x256xf32, #tpu.memory_space<vmem>>, vector<8x256xf32>,
    } else {
    }
    %true = arith.constant true
    %11 = arith.xori %8, %true : i1
    %12 = arith.extui %11 : i1 to i32
    %c0_i32_5 = arith.constant 0 : i32
    %13 = arith.cmpi ne, %12, %c0_i32_5 : i32
    scf.if %13 {
      %c0_6 = arith.constant 0 : index
      %c0_7 = arith.constant 0 : index
      %14 = vector.load %arg6[%c0_6, %c0_7] : memref<8x256xf32, #tpu.memory_space<vmem>>, vector<8x256xf32>
      tpu.vector_store %arg6[%c0_6, %c0_7], %4 {strides = array<i32>} : memref<8x256xf32, #tpu.memory_space<vmem>>, vector<8x256xf32>,
    } else {
    }
    return
  }
  func.func @transform_0(%arg0: i32, %arg1: i32, %arg2: memref<1x4xi32, #tpu.memory_space<smem>>) -> (i32, i32) {
    %c0_i32 = arith.constant 0 : i32
    %c0_i32_0 = arith.constant 0 : i32
    return %arg1, %c0_i32 : i32, i32
  }
  func.func @transform_1(%arg0: i32, %arg1: i32, %arg2: memref<1x4xi32, #tpu.memory_space<smem>>) -> (i32, i32) {
    %c0_i32 = arith.constant 0 : i32
    %c0_i32_0 = arith.constant 0 : i32
    return %arg0, %c0_i32 : i32, i32
  }
  func.func @transform_2(%arg0: i32, %arg1: i32, %arg2: memref<1x4xi32, #tpu.memory_space<smem>>) -> (i32, i32) {
    %c0_i32 = arith.constant 0 : i32
    %c0_i32_0 = arith.constant 0 : i32
    return %arg1, %c0_i32 : i32, i32
  }
  func.func @transform_3(%arg0: i32, %arg1: i32, %arg2: memref<1x4xi32, #tpu.memory_space<smem>>) -> (i32, i32) {
    %c0_i32 = arith.constant 0 : i32
    return %arg1, %arg0 : i32, i32
  }
}

</mosaic_0001>

<bundles_post_ra>
// kernel: tpu_custom_call.1
= control target key start
LH: loop header
LB: loop body
LE: loop exit
PB: predicated region body
PF: predicated region fallthrough
CT: control target
= control target key end

     0   :  { %s1150_s0 = inlined_call_operand.vmem [shape: s32[1,4], index: 0, kind: input, shape index: {}]   ;;  %s1151_s1 = inlined_call_operand.vmem [shape: f32[8,32], index: 1, kind: input, shape index: {}]   ;;  %s1152_s2 = inlined_call_operand.vmem [shape: f32[1024,32], index: 2, kind: input, shape index: {}]   ;;  %s1153_s3 = inlined_call_operand.vmem [shape: s32[8,1], index: 3, kind: input, shape index: {}]   ;;  %s1154_s4 = inlined_call_operand.hbm [shape: f32[8,1024], index: 4, kind: output, shape index: {}]  }
   0x1   :  { %s9_s17 = sshll.u32 %s1150_s0, 4  ;;  %s10_s17 = int_to_ptr.vmem [resolvable:$true] %s9_s17 }
   0x2   :  { %s815_s18 = scalar_lea.vmem %s10_s17, 16  ;;  %p820_p1 = scmp.lt.s32.totalorder %s10_s17, %s10_s17 }
   0x3   :  { %p816_p0 = scmp.ne.s32.totalorder %s10_s17, %s815_s18  ;;  %p821_p2 = scmp.lt.s32.totalorder %s815_s18, %s815_s18 }
   0x5   :  { %p822_p3 = por %p821_p2, %p820_p1 }
   0x7   :  { %p823_p4 = pnand %p822_p3, %p816_p0 }
   0x9   :  { %826 = shalt.err (!%p823_p4)  }
   0xa   :  { %s909_s19 = smov [#allocation3]  }
   0xb   :  { %12 = dma.vmem_to_smem %s10_s17, 16, %s909_s19, [#allocation2] }
   0xc   :  { %879 = dma.done.wait [#allocation2], 16 }
   0xd   :  { %880 = vsyncadd [#allocation2], 4294967280 }
   0xe   :  { %14 = sfence }
   0xf   :  { %15 = vsyncpa [#allocation5], 0 }
  0x10   :  { %17 = vsyncpa [#allocation5 + $0x1], 0  ;;  %s940_s20 = smov 0   ;;  %s942_s21 = smov 0  }
  0x11   :  { %s944_s0 = smov 0   ;;  %s946_s22 = smov 0  }
  0x12   :  { %s948_s23 = smov 0   ;;  %s950_s24 = smov 0  }
  0x13 LB: > { %s616_s25 = sadd.s32 4294967295, %s907_s24   ;;  %s617_s26 = sadd.s32 4294967294, %s907_s24   ;;  %s907_s24 = sphi %s950_s24, %s23_s24   ;;  %s903_s23 = sphi %s948_s23, %s1163_s23   ;;  %s899_s22 = sphi %s946_s22, %s1162_s22   ;;  %s895_s0 = sphi %s944_s0, %s1161_s0   ;;  %s891_s21 = sphi %s942_s21, %s1160_s21   ;;  %s887_s20 = sphi %s940_s20, %s1159_s20  }
  0x14   : > { %s35_s27 = sadd.s32 1, %s903_s23  ;;  %s122_s28 = sadd.s32 1, %s895_s0 }
  0x15   : > { %p37_p5 = scmp.ge.s32.totalorder %s35_s27, 4  ;;  %p132_p6 = scmp.ne.s32.totalorder %s895_s0, %s891_s21 }
  0x16   : > { %p133_p7 = scmp.eq.s32.totalorder %s616_s25, 3  ;;  %p138_p8 = scmp.ne.s32.totalorder %s891_s21, %s887_s20 }
  0x17   : > { %s1165_s27 = smov (%p37_p5, %s35_s27), 0  ;;  %p139_p10 = scmp.eq.s32.totalorder %s617_s26, 3 }
  0x18   : > { %p980_p9 = por %p133_p7, %p132_p6  ;;  %s118_s30 = ssub.s32 %s903_s23, %s1165_s27 }
  0x19   : > { %p622_p11 = scmp.ge.s32.totalorder %s907_s24, 1  ;;  %p120_p12 = scmp.eq.s32.totalorder %s118_s30, 0 }
  0x1a   : > { %p987_p13 = por %p139_p10, %p138_p8  ;;  %p180_p0 = scmp.lt.s32.totalorder %s907_s24, 5 }
  0x1b   : > { %s993_s6 = scalar_select %p120_p12, %s895_s0, %s122_s28  }
  0x1c   : > { %p181_p1 = pnand %p622_p11, %p180_p0 }
  0x1d   : > { %s209_s7 = sand.u32 (!%p181_p1), 1, %s891_s21   ;;  %s624_s8 = sshll.u32 (!%p181_p1), %s899_s22, 5  ;;  %vm260_vm0 = vcmask (!%p181_p1), 261120   ;;  %v1000_v0 = vld [vmem:[%s1151_s1] sm:$0xff] (!%p181_p1) }
  0x1e   : > { %184 = sbr.rel (%p181_p1) target bundleno = 381 (0x17d), region = 32  ;;  %s1004_s11 = sshll.u32 (!%p181_p1), %s209_s7, 4  ;;  %703 = vmatprep.mubr.msk.f32.mxu0 (!%p181_p1), %vm260_vm0, %v1000_v0  ;;  %vm1015_vm1 = vmpackc.low (!%p181_p1), %vm260_vm0, %vm260_vm0 }
  0x1f   : > { %p217_p2 = scmp.lt.s32.totalorder (!%p181_p1), %s624_s8, 127  ;;  %s433_s16 = sshra.s32 (!%p181_p1), %s899_s22, 7 }
  0x20   : > { %s659_s17 = sshll.u32 (!%p181_p1), %s433_s16, 7  ;;  %s438_s18 = sand.u32 (!%p181_p1), 127, %s899_s22 }
  0x21   : > { %s439_s19 = sadd.s32 (!%p181_p1), %s659_s17, %s438_s18  ;;  %s1090_s26 = scalar_lea.vmem (!%p181_p1), [#allocation4], %s1004_s11 }
  0x22   : > { %s1087_s25 = sld [smem:[#allocation3 + %s439_s19]] (!%p181_p1) }
  0x25   : > { %s1167_s8 = smov (!%p217_p2, %s624_s8), 127 }
  0x26   : > { %s625_s12 = sshll.u32 %s1167_s8, 3 }
  0x27   : > { %s1011_s15 = scalar_lea.vmem %s1152_s2, %s625_s12 }
  0x28   : > { %v244_v2 = vld [vmem:[%s1011_s15 + $0x80] sm:$0xff]  ;;  %v245_v3 = vld [vmem:[%s1011_s15 + $0x88] sm:$0xff]  ;;  %v246_v7 = vld [vmem:[%s1011_s15 + $0x90] sm:$0xff]  ;;  %p660_p3 = scmp.le.s32.totalorder %s1087_s25, 0 }
  0x29   : > { %v228_v4 = vld [vmem:[%s1011_s15] sm:$0xff]  ;;  %v705_v5 = vpack.c.bf16 %v245_v3, %v244_v2  ;;  %v229_v6 = vld [vmem:[%s1011_s15 + $0x8] sm:$0xff]  ;;  %v247_v8 = vld [vmem:[%s1011_s15 + $0x98] sm:$0xff]  ;;  %s663_s8 = sshll.u32 (!%p660_p3), %s899_s22, 8  ;;  %v910_v55 = vmov (!%p660_p3), 0  }
  0x2a   : > { %v708_v9 = vpack.c.bf16 %v229_v6, %v228_v4  ;;  %v711_v10 = vpack.c.bf16 %v247_v8, %v246_v7  ;;  %v230_v11 = vld [vmem:[%s1011_s15 + $0x10] sm:$0xff]  ;;  %v231_v12 = vld [vmem:[%s1011_s15 + $0x18] sm:$0xff]  ;;  %v248_v13 = vld [vmem:[%s1011_s15 + $0xa0] sm:$0xff]  ;;  %810 = vset.pattern.permute.xlu0 (!%p660_p3), %v910_v55  ;;  %v479_v56 = vstv (!%p660_p3), %s663_s8 }
  0x2b   : > { %707 = vmatprep.subr.msk.bf16.mxu0 %vm1015_vm1, %v705_v5  ;;  %v249_v14 = vld [vmem:[%s1011_s15 + $0xa8] sm:$0xff]  ;;  %v714_v15 = vpack.c.bf16 %v231_v12, %v230_v11  ;;  %v232_v17 = vld [vmem:[%s1011_s15 + $0x20] sm:$0xff]  ;;  %v250_v19 = vld [vmem:[%s1011_s15 + $0xb0] sm:$0xff] }
  0x2c   : > { %710 = vmatpush3.bf16.xpose.msk.msra.mxu0 %vm1015_vm1, %v708_v9  ;;  %v717_v16 = vpack.c.bf16 %v249_v14, %v248_v13  ;;  %v233_v18 = vld [vmem:[%s1011_s15 + $0x28] sm:$0xff]  ;;  %v251_v20 = vld [vmem:[%s1011_s15 + $0xb8] sm:$0xff]  ;;  %v234_v23 = vld [vmem:[%s1011_s15 + $0x30] sm:$0xff] }
  0x2d   : > { %713 = vmatprep.subr.msk.bf16.mxu0 %vm1015_vm1, %v711_v10  ;;  %v720_v21 = vpack.c.bf16 %v233_v18, %v232_v17  ;;  %v723_v22 = vpack.c.bf16 %v251_v20, %v250_v19  ;;  %v235_v24 = vld [vmem:[%s1011_s15 + $0x38] sm:$0xff]  ;;  %v252_v25 = vld [vmem:[%s1011_s15 + $0xc0] sm:$0xff]  ;;  %v253_v26 = vld [vmem:[%s1011_s15 + $0xc8] sm:$0xff]  ;;  %v481_v10 = vlaneseq (!%p660_p3) }
  0x2e   : > { %v726_v27 = vpack.c.bf16 %v235_v24, %v234_v23  ;;  %v729_v28 = vpack.c.bf16 %v253_v26, %v252_v25  ;;  %v236_v29 = vld [vmem:[%s1011_s15 + $0x40] sm:$0xff]  ;;  %v237_v30 = vld [vmem:[%s1011_s15 + $0x48] sm:$0xff]  ;;  %v254_v31 = vld [vmem:[%s1011_s15 + $0xd0] sm:$0xff] }
  0x2f   : > { %v255_v32 = vld [vmem:[%s1011_s15 + $0xd8] sm:$0xff]  ;;  %v732_v33 = vpack.c.bf16 %v237_v30, %v236_v29  ;;  %v238_v35 = vld [vmem:[%s1011_s15 + $0x50] sm:$0xff]  ;;  %v256_v37 = vld [vmem:[%s1011_s15 + $0xe0] sm:$0xff] }
  0x30   : > { %v735_v34 = vpack.c.bf16 %v255_v32, %v254_v31  ;;  %v239_v36 = vld [vmem:[%s1011_s15 + $0x58] sm:$0xff]  ;;  %v257_v38 = vld [vmem:[%s1011_s15 + $0xe8] sm:$0xff]  ;;  %v240_v41 = vld [vmem:[%s1011_s15 + $0x60] sm:$0xff] }
  0x31   : > { %v738_v39 = vpack.c.bf16 %v239_v36, %v238_v35  ;;  %v741_v40 = vpack.c.bf16 %v257_v38, %v256_v37  ;;  %v241_v42 = vld [vmem:[%s1011_s15 + $0x68] sm:$0xff]  ;;  %v258_v43 = vld [vmem:[%s1011_s15 + $0xf0] sm:$0xff]  ;;  %v259_v44 = vld [vmem:[%s1011_s15 + $0xf8] sm:$0xff] }
  0x32   : > { %v744_v45 = vpack.c.bf16 %v241_v42, %v240_v41  ;;  %v747_v46 = vpack.c.bf16 %v259_v44, %v258_v43  ;;  %v242_v47 = vld [vmem:[%s1011_s15 + $0x70] sm:$0xff]  ;;  %v243_v48 = vld [vmem:[%s1011_s15 + $0x78] sm:$0xff]  ;;  %v477_v54 = vld [vmem:[%s1153_s3] sm:$0xff] (!%p660_p3) }
  0x33   : > { %v750_v49 = vpack.c.bf16 %v243_v48, %v242_v47  ;;  %v480_v57 = vsub.s32 (!%p660_p3), %v477_v54, %v479_v56 }
  0x34   : > { %716 = vmatpush3.bf16.xpose.msk.msra.mxu0 %vm1015_vm1, %v714_v15  ;;  %v482_v15 = vand.u32 (!%p660_p3), 127, %v481_v10 }
  0x35   : > { %719 = vmatprep.subr.msk.bf16.mxu0 %vm1015_vm1, %v717_v16  ;;  %485 = vperm.xlu0 (!%p660_p3), %810, %v480_v57  }
  0x36   : > { %v483_v20 = vadd.s32 (!%p660_p3), 128, %v482_v15 }
  0x3c   : > { %722 = vmatpush3.bf16.xpose.msk.msra.mxu0 %vm1015_vm1, %v720_v21 }
  0x3d   : > { %725 = vmatprep.subr.msk.bf16.mxu0 %vm1015_vm1, %v723_v22 }
  0x44   : > { %728 = vmatpush3.bf16.xpose.msk.msra.mxu0 %vm1015_vm1, %v726_v27 }
  0x45   : > { %731 = vmatprep.subr.msk.bf16.mxu0 %vm1015_vm1, %v729_v28 }
  0x4c   : > { %734 = vmatpush3.bf16.xpose.msk.msra.mxu0 %vm1015_vm1, %v732_v33 }
  0x4d   : > { %737 = vmatprep.subr.msk.bf16.mxu0 %vm1015_vm1, %v735_v34 }
  0x54   : > { %740 = vmatpush3.bf16.xpose.msk.msra.mxu0 %vm1015_vm1, %v738_v39 }
  0x55   : > { %743 = vmatprep.subr.msk.bf16.mxu0 %vm1015_vm1, %v741_v40 }
  0x5c   : > { %746 = vmatpush3.bf16.xpose.msk.msra.mxu0 %vm1015_vm1, %v744_v45 }
  0x5d   : > { %749 = vmatprep.subr.msk.bf16.mxu0 %vm1015_vm1, %v747_v46 }
  0x64   : > { %752 = vmatpush3.bf16.xpose.msk.msra.mxu0 %vm1015_vm1, %v750_v49 }
  0x6b   : > { %704 = vmatmul.mubr.msk.f32.vlgmr.msra.gmra.mrb[0].mxu0 %vm260_vm0, %v1000_v0 }
  0xb4   : > { %v486_v23 = vpop.permute.xlu0 (!%p660_p3), %485 }
  0xb5   : > { %vm487_vm8 = vcmp.eq.s32.totalorder (!%p660_p3), %v482_v15, %v486_v23  ;;  %vm488_vm9 = vcmp.eq.s32.totalorder (!%p660_p3), %v483_v20, %v486_v23 }
 0x13a   : > { %444 = sbr.rel (%p660_p3) target bundleno = 348 (0x15c), region = 36 }
 0x13e   : > { %v426_v50 = vpop.f32.mrb[0].mxu0 }
 0x13f   : > { %v431_v51 = vmul.f32 30.0, %v426_v50  ;;  %v428_v52 = vpop.f32.mrb[1].mxu0  ;;  %v445_v58 = vmul.f32 (!%p660_p3), %v426_v50, %v426_v50  ;;  %v465_v11 = vmul.f32 (!%p660_p3), 26.327477, %v426_v50  ;;  %vm471_vm6 = vcmp.gt.f32.partialorder (!%p660_p3), %v426_v50, -0.87758255 }
 0x140   : > { %v432_v53 = vmul.f32 30.0, %v428_v52  ;;  %v446_v59 = vmul.f32 (!%p660_p3), %v428_v52, %v428_v52  ;;  %v466_v12 = vmul.f32 (!%p660_p3), 26.327477, %v428_v52  ;;  %vm472_vm7 = vcmp.gt.f32.partialorder (!%p660_p3), %v428_v52, -0.87758255 }
 0x141   : > { %v447_v60 = vmin.f32 %v445_v58, 1.0  ;;  %v661_v18 = vadd.f32 -7.191383, %v431_v51 }
 0x142   : > { %v448_v61 = vmin.f32 %v446_v59, 1.0  ;;  %v662_v19 = vadd.f32 -7.191383, %v432_v53 }
 0x143   : > { %v449_v62 = vsub.f32 1.0, %v447_v60 }
 0x144   : > { %v450_v63 = vsub.f32 1.0, %v448_v61 }
 0x145   : > { %811 = vrsqrt.f32 %v449_v62  ;;  %vm453_vm2 = vcmp.eq.f32.partialorder %v449_v62, inf  ;;  %v456_v4 = vand.u32 2147483648, %v449_v62  ;;  %vm455_vm4 = vcmp.eq.f32.partialorder %v449_v62, 0.0 }
 0x146   : > { %813 = vrsqrt.f32 %v450_v63  ;;  %vm460_vm3 = vcmp.eq.f32.partialorder %v450_v63, inf  ;;  %v463_v5 = vand.u32 2147483648, %v450_v63  ;;  %vm462_vm5 = vcmp.eq.f32.partialorder %v450_v63, 0.0 }
 0x14f   : > { %v812_v0 = vpop.eup %811 }
 0x150   : > { %v814_v1 = vpop.eup %813  ;;  %v452_v2 = vmul.f32 %v812_v0, %v449_v62 }
 0x151   : > { %v459_v3 = vmul.f32 %v814_v1, %v450_v63 }
 0x152   : > { %v454_v6 = vsel %vm453_vm2, %v449_v62, %v452_v2 }
 0x153   : > { %v461_v7 = vsel %vm460_vm3, %v450_v63, %v459_v3  ;;  %v457_v8 = vsel %vm455_vm4, %v456_v4, %v454_v6 }
 0x154   : > { %v464_v9 = vsel %vm462_vm5, %v463_v5, %v461_v7  ;;  %v467_v13 = vmul.f32 14.382766, %v457_v8 }
 0x155   : > { %v468_v14 = vmul.f32 14.382766, %v464_v9 }
 0x156   : > { %v469_v16 = vsub.f32 %v465_v11, %v467_v13 }
 0x157   : > { %v470_v17 = vsub.f32 %v466_v12, %v468_v14 }
 0x158   : > { %v475_v21 = vsel %vm471_vm6, %v469_v16, %v661_v18 }
 0x159   : > { %v476_v22 = vsel %vm472_vm7, %v470_v17, %v662_v19  ;;  %v489_v24 = vsel %vm487_vm8, %v475_v21, %v431_v51 }
 0x15a   : > { %v490_v25 = vsel %vm488_vm9, %v476_v22, %v432_v53  ;;  %491 = vst [vmem:[%s1090_s26] sm:$0xff] %v489_v24 }
 0x15b   : > { %492 = vst [vmem:[%s1090_s26 + $0x8] sm:$0xff] %v490_v25 }
 0x15c PF: > { %p664_p4 = scmp.gt.s32.totalorder %s1087_s25, 0 }
 0x15d   : > { %497 = vst [vmem:[%s1090_s26] sm:$0xff] (!%p664_p4), %v431_v51  ;;  %498 = vst [vmem:[%s1090_s26 + $0x8] sm:$0xff] (!%p664_p4), %v432_v53 }
 0x15e   : > { %496 = sbr.rel (%p664_p4) target bundleno = 357 (0x165), region = 40 }
 0x165 PF: > { %s670_s9 = sshll.u32 %s899_s22, 8  ;;  %s516_s13 = sshll.u32 %s1090_s26, 4  ;;  %s517_s13 = int_to_ptr.vmem [resolvable:$true] %s516_s13 }
 0x166   : > { %s1106_s12 = scalar_lea.hbm %s1154_s4, %s670_s9  ;;  %s500_s14 = scalar_lea.sflag [#allocation5], %s209_s7 }
 0x167   : > { %s827_s15 = scalar_lea.vmem %s517_s13, 256  ;;  %s911_s16 = smov [#allocation4]  }
 0x168   : > { %p828_p5 = scmp.ne.s32.totalorder %s517_s13, %s827_s15  ;;  %s831_s17 = sshll.u32 %s911_s16, 4  ;;  %s832_s17 = int_to_ptr.vmem [resolvable:$false] %s831_s17 }
 0x169   : > { %s833_s18 = scalar_lea.vmem %s832_s17, 512  ;;  %p834_p8 = scmp.lt.s32.totalorder %s517_s13, %s832_s17 }
 0x16a   : > { %p829_p6 = pnand %p828_p5, %p980_p9  ;;  %p835_p10 = scmp.lt.s32.totalorder %s833_s18, %s827_s15 }
 0x16c   : > { %p830_p7 = pneg %p829_p6  ;;  %p836_p11 = por %p835_p10, %p834_p8 }
 0x16e   : > { %p837_p12 = pnand %p836_p11, %p830_p7 }
 0x170   : > { %840 = shalt.err (!%p837_p12)
}
 0x171   : > { %s841_s22 = scalar_lea.hbm %s1106_s12, 256  ;;  %s845_s25 = scalar_lea.hbm %s1154_s4, 1024 }
 0x172   : > { %p842_p0 = scmp.ne.s32.totalorder %s1106_s12, %s841_s22  ;;  %p846_p3 = scmp.lt.u32.totalorder %s1106_s12, %s1154_s4 }
 0x173   : > { %p847_p4 = scmp.lt.u32.totalorder %s845_s25, %s841_s22  ;;  %p849_p6 = scmp.lt.u32.totalorder %s841_s22, %s1106_s12 }
 0x174   : > { %p843_p1 = pnand %p842_p0, %p980_p9 }
 0x175   : > { %p848_p5 = por %p847_p4, %p846_p3 }
 0x176   : > { %p844_p2 = pneg %p843_p1 }
 0x177   : > { %p850_p7 = por %p849_p6, %p848_p5 }
 0x179   : > { %p851_p8 = pnand %p850_p7, %p844_p2 }
 0x17b   : > { %854 = shalt.err (!%p851_p8)
}
 0x17c   : > { %753 = dma.vmem_to_hbm [thread:$0]  (%p980_p9), %s517_s13, 256, %s1106_s12, %s500_s14  }
 0x17d PF: > { %p759_p10 = scmp.ge.s32.totalorder %s907_s24, 2  ;;  %s528_s30 = sand.u32 1, %s887_s20  }
 0x17e   : > { %s529_s8 = scalar_lea.sflag [#allocation5], %s528_s30 }
 0x17f   : > { %p756_p11 = pnand %p759_p10, %p987_p13 }
 0x181   : > { %882 = dma.done.wait (!%p756_p11), %s529_s8, 256  }
 0x182   : > { %884 = vsyncadd (!%p756_p11), %s529_s8, 4294967040  ;;  %s23_s24 = sadd.s32 1, %s907_s24   ;;  %s1159_s20 = smov %s891_s21 }
 0x183   : > { %p20_p12 = scmp.ge.s32.totalorder %s23_s24, 6   ;;  %s1160_s21 = smov %s895_s0 }
 0x184   : > { %s1161_s0 = smov %s993_s6  ;;  %s1162_s22 = smov %s903_s23 }
 0x185   : > { %s1163_s23 = smov %s1165_s27  ;;  %22 = sbr.rel (!%p20_p12) target bundleno = 19 (0x13), region = 81 }
 0x18c   :  { %534 = vsyncpa [#allocation5], 1 }
 0x18d   :  { %536 = vsyncpa [#allocation5 + $0x1], 1 }

</bundles_post_ra>
